<compile_context>
chip_gen: v5e
topology: v5e:2x2
jax: 0.10.0
libtpu: 0.0.40
codegen_flags: <defaults>
</compile_context>

<pallas_src>
import functools

import numpy as np
import jax
import jax.numpy as jnp
from jax.experimental import pallas as pl
from jax.experimental.pallas import tpu as pltpu

NUM_FEATURES = 32
TANH_SCALAR = 10.0
WEIGHTING_SETTING = "close_to_one"   # exact_one | close_to_one | free
TRAINING_STRATEGY = "end2end"
NORMALIZE_LOSS_SCALE = False

LANE_TILE = 2048          # nodes per grid step (lane axis), multiple of 128
SLAB_ROWS = 8             # natural sublane tile for the loss slab


def _padded_nodes(n):
    """Round node count up so the grid has an even number (>=2) of LANE_TILE
    steps (keeps the 'parallel' axis shardable across v7x's 2 TensorCores)."""
    steps = max(2, -(-n // LANE_TILE))
    if steps % 2:
        steps += 1
    return steps * LANE_TILE


# ----------------------------- Pallas kernels ------------------------------

def _weighting_kernel(w_ref, b_ref, n_ref, x_ref, o_ref, *, setting,
                      tanh_scalar, lane_tile):
    """score[n] = WeightingModel(features[:, n]) for a tile of nodes.

    x_ref: [F, TN] bf16 (feature rows on sublanes, nodes on lanes)
    w_ref: [F, 1]  f32 Linear weight (resident, untiled VMEM)
    b_ref: (1, 1)  f32 Linear bias in SMEM (scalar read)
    n_ref: (1, 1)  i32 number of valid nodes in SMEM
    o_ref: [1, TN] f32 lane-dense scores (padded lanes forced to 0)
    """
    # Validity mask so padded lanes come out as exactly 0.
    lane = jax.lax.broadcasted_iota(jnp.int32, o_ref.shape, 1)
    gidx = lane + pl.program_id(0) * lane_tile
    valid = (gidx < n_ref[0, 0]).astype(jnp.float32)          # [1, TN]

    if setting == "exact_one":
        o_ref[...] = valid
        return

    x = x_ref[...].astype(jnp.float32)                        # [F, TN]  (bf16 -> f32)
    w = w_ref[...].astype(jnp.float32)                        # [F, 1]
    xw = x * w                                                # VPU
    f = xw.shape[0]
    if f % 8 == 0 and f > 8:
        # Split reduce: (f/8 - 1) VALU vreg-adds + ONE 8-sublane XLU reduce.
        part = xw[0:8]
        for s in range(8, f, 8):
            part = part + xw[s:s + 8]
        raw = jnp.sum(part, axis=0, keepdims=True) + b_ref[0, 0]   # [1, TN]
    else:
        raw = jnp.sum(xw, axis=0, keepdims=True) + b_ref[0, 0]

    if setting == "close_to_one":
        score = 1.0 + jnp.tanh(raw) * (1.0 / tanh_scalar)
    else:  # "free"
        score = raw
    o_ref[...] = score * valid


def _loss_kernel(d_ref, o_ref, *, normalize):
    """Masked per-node MSE loss + percentage error, natural (8,128) tiling.

    d_ref: [8, TN] rows = (pred, gold, mask, 0, 0, 0, 0, 0)
    o_ref: [8, TN] rows = (loss, perc_error, 0, 0, 0, 0, 0, 0)
    """
    data = d_ref[...]                                         # [8, TN]
    pred = data[0:1, :]
    gold = data[1:2, :]
    mask = data[2:3, :]
    diff = pred - gold
    loss = diff * diff
    safe_gold = jnp.where(mask > 0.0, gold, 1.0)
    # Exact reciprocal (not approx EUP) so the percentage error / normalized
    # loss carry no ~2^-12 relative error (reviewer correctness concern).
    inv_abs_gold = 1.0 / jnp.abs(safe_gold)
    if normalize:
        loss = loss * (inv_abs_gold * inv_abs_gold)
    # TODO(synk): get_percentage_error_item is not defined in the reference
    # source; assumed to be 100 * |gold - pred| / |gold|.
    perc = 100.0 * jnp.abs(diff) * inv_abs_gold
    zeros = jnp.zeros((SLAB_ROWS - 2,) + diff.shape[1:], jnp.float32)
    # Single full-block store (one vector-store stream; matters on v5e).
    o_ref[...] = jnp.concatenate([loss * mask, perc * mask, zeros], axis=0)


def node_scores(features_bf16, weight, bias, n_valid, *,
                setting=WEIGHTING_SETTING, tanh_scalar=TANH_SCALAR):
    """features_bf16: [F, N_pad] bf16 (N_pad multiple of LANE_TILE),
    weight: [F, 1] f32, bias: [1, 1] f32, n_valid: [1, 1] i32
    -> device array [1, N_pad] of f32 scores (padded lanes are 0)."""
    f, n_pad = features_bf16.shape
    kern = functools.partial(_weighting_kernel, setting=setting,
                             tanh_scalar=tanh_scalar, lane_tile=LANE_TILE)
    return pl.pallas_call(
        kern,
        out_shape=jax.ShapeDtypeStruct((1, n_pad), jnp.float32),
        grid=(n_pad // LANE_TILE,),
        in_specs=[
            pl.BlockSpec(memory_space=pltpu.MemorySpace.VMEM),      # weight (resident, untiled)
            pl.BlockSpec(memory_space=pltpu.MemorySpace.SMEM),      # bias scalar
            pl.BlockSpec(memory_space=pltpu.MemorySpace.SMEM),      # n_valid scalar
            pl.BlockSpec((f, LANE_TILE), lambda i: (0, i)),         # features tile (bf16)
        ],
        out_specs=pl.BlockSpec((1, LANE_TILE), lambda i: (0, i)),
        compiler_params=pltpu.CompilerParams(
            dimension_semantics=("parallel",)),
    )(weight, bias, n_valid, features_bf16)


def node_losses(slab, *, normalize=NORMALIZE_LOSS_SCALE):
    """slab: [8, N_pad] (pred/gold/mask/zeros) -> [8, N_pad] (loss/perc/zeros)."""
    rows, n_pad = slab.shape
    assert rows == SLAB_ROWS
    kern = functools.partial(_loss_kernel, normalize=normalize)
    return pl.pallas_call(
        kern,
        out_shape=jax.ShapeDtypeStruct((SLAB_ROWS, n_pad), jnp.float32),
        grid=(n_pad // LANE_TILE,),
        in_specs=[pl.BlockSpec((SLAB_ROWS, LANE_TILE), lambda i: (0, i))],
        out_specs=pl.BlockSpec((SLAB_ROWS, LANE_TILE), lambda i: (0, i)),
        compiler_params=pltpu.CompilerParams(
            dimension_semantics=("parallel",)),
    )(slab)


# ------------------------------ Tree glue -----------------------------------

class Node:
    def __init__(self, idx, features, child_nodes=None,
                 predicted_energy=None, gold_energy=None):
        self.idx = idx
        self.features = features
        self.child_nodes = child_nodes or []
        self.predicted_energy = predicted_energy
        self.gold_energy = gold_energy
        self.loss = 0.0
        self.subtree_loss = 0.0
        self.subtree_error_sum = 0.0
        self.subtree_error_count = 0
        self.subtree_error_perc = 0.0


def _energy_pass(node, scores, training_strategy, training):
    """Bottom-up predicted-energy computation (pure Python floats + numpy)."""
    if not node.child_nodes:
        assert node.predicted_energy is not None
        return node
    pred = 0.0
    for child in node.child_nodes:
        _energy_pass(child, scores, training_strategy, training)
        child_score = float(scores[child.idx])
        if training_strategy in ("none", "end2end"):
            pred += child_score * float(child.predicted_energy)
        elif training_strategy == "stepwise":
            e = child.gold_energy if training else child.predicted_energy
            pred += child_score * float(e)
    if training_strategy == "unstructured":
        pred = float(scores[node.idx])
    node.predicted_energy = pred
    return node


def _aggregate_pass(node, loss_arr, perc_arr):
    """Bottom-up aggregation of subtree loss / error stats (mirrors PyTorch)."""
    if not node.child_nodes:
        node.loss = node.subtree_loss = 0.0
        node.subtree_error_sum = 0.0
        node.subtree_error_count = 0
        node.subtree_error_perc = 0.0
        return node
    node.subtree_loss = 0.0
    node.subtree_error_sum = 0.0
    node.subtree_error_count = 0
    for child in node.child_nodes:
        _aggregate_pass(child, loss_arr, perc_arr)
        node.subtree_loss += child.subtree_loss
        node.subtree_error_sum += child.subtree_error_sum
        node.subtree_error_count += child.subtree_error_count
    # NOTE: original PyTorch uses truthiness (`if node.gold_energy:`); we use
    # `is not None` so a legitimate 0.0 gold energy is still counted.
    if node.gold_energy is not None:
        node.loss = float(loss_arr[node.idx])
        node.subtree_loss += node.loss
        node.subtree_error_sum += float(perc_arr[node.idx])
        node.subtree_error_count += 1
        node.subtree_error_perc = float(node.subtree_error_sum /
                                        node.subtree_error_count)
    return node


def recursive_tree_computation(root, all_nodes, weight, bias, *, training=False):
    n = len(all_nodes)
    n_pad = _padded_nodes(n)

    # Pack features as [F, N_pad] in numpy, ship once as bf16 (halves the
    # HBM->VMEM DMA bytes of the bandwidth-bound weighting kernel).
    feats_np = np.zeros((NUM_FEATURES, n_pad), np.float32)
    for nd in all_nodes:
        feats_np[:, nd.idx] = np.asarray(nd.features, np.float32)
    feats_dev = jnp.asarray(feats_np, dtype=jnp.bfloat16)
    n_valid = jnp.full((1, 1), n, jnp.int32)

    # Kernel 1: batched lane-dense WeightingModel scores for every node.
    scores_dev = node_scores(feats_dev, weight, bias, n_valid)      # [1, n_pad]
    scores_np = np.asarray(jax.device_get(scores_dev))[0]           # pull ONCE
    # Padded lanes (idx >= n) are exactly 0 (masked in-kernel).

    # Host recursion (tree structure is data-dependent Python objects).
    _energy_pass(root, scores_np, TRAINING_STRATEGY, training)

    # Build the fused pred/gold/mask slab in numpy (8 rows -> natural (8,128)
    # tiling), ship once.
    slab_np = np.zeros((SLAB_ROWS, n_pad), np.float32)
    for nd in all_nodes:
        if nd.child_nodes and nd.gold_energy is not None:
            slab_np[0, nd.idx] = float(nd.predicted_energy)
            slab_np[1, nd.idx] = float(nd.gold_energy)
            slab_np[2, nd.idx] = 1.0

    # Kernel 2: per-node MSE loss + percentage error (masked), fused I/O.
    out_dev = node_losses(jnp.asarray(slab_np))                     # [8, n_pad]
    out_np = np.asarray(jax.device_get(out_dev))                    # pull ONCE
    loss_np, perc_np = out_np[0], out_np[1]

    _aggregate_pass(root, loss_np, perc_np)
    return root, scores_dev[0], out_dev[0], out_dev[1]


# --------------------------------- main --------------------------------------

if __name__ == "__main__":
    key = jax.random.PRNGKey(0)
    k_feat, k_w, k_e = jax.random.split(key, 3)

    # 7-node tree: root(0) -> {1, 2}; 1 -> {leaf 3, leaf 4}; 2 -> {leaf 5, leaf 6}
    n_nodes = 7
    feats = jax.random.normal(k_feat, (n_nodes, NUM_FEATURES), jnp.float32)
    leaf_energy = jax.random.uniform(k_e, (4,), jnp.float32, 1.0, 5.0)
    feats_np = np.asarray(feats)
    leaf_e_np = np.asarray(leaf_energy)

    leaves = [Node(3 + i, feats_np[3 + i], predicted_energy=float(leaf_e_np[i]))
              for i in range(4)]
    n1 = Node(1, feats_np[1], child_nodes=leaves[:2], gold_energy=4.0)
    n2 = Node(2, feats_np[2], child_nodes=leaves[2:], gold_energy=6.0)
    root = Node(0, feats_np[0], child_nodes=[n1, n2], gold_energy=10.0)
    all_nodes = [root, n1, n2] + leaves

    # Deterministic WeightingModel parameters (torch.nn.Linear(F, 1) shapes).
    weight = jax.random.normal(k_w, (NUM_FEATURES, 1), jnp.float32) * 0.1
    bias = jnp.full((1, 1), 0.05, jnp.float32)

    root, scores, loss_arr, perc_arr = recursive_tree_computation(
        root, all_nodes, weight, bias, training=False)
    jax.block_until_ready((scores, loss_arr, perc_arr))

    # Lightweight correctness check against plain-JAX reference math.
    # Features are bf16 on device, so round the reference the same way.
    feats_r = feats.astype(jnp.bfloat16).astype(jnp.float32)
    ref_scores = 1.0 + jnp.tanh(feats_r @ weight + bias[0, 0])[:, 0] / TANH_SCALAR
    rs = np.asarray(ref_scores)
    sc = np.asarray(jax.device_get(scores))
    assert np.allclose(sc[:n_nodes], rs, atol=1e-4), "score mismatch"
    assert np.all(sc[n_nodes:] == 0.0), "padded score lanes not zeroed"

    ref_e1 = rs[3] * leaf_e_np[0] + rs[4] * leaf_e_np[1]
    ref_e2 = rs[5] * leaf_e_np[2] + rs[6] * leaf_e_np[3]
    ref_root = rs[1] * ref_e1 + rs[2] * ref_e2
    assert abs(float(root.predicted_energy) - float(ref_root)) < 1e-4, "energy mismatch"

    loss_np = np.asarray(jax.device_get(loss_arr))
    assert abs(loss_np[0] - (ref_root - 10.0) ** 2) < 1e-3, "root loss mismatch"
    assert abs(loss_np[1] - (ref_e1 - 4.0) ** 2) < 1e-3, "n1 loss mismatch"

    print("KERNEL_OK")
</pallas_src>

<mosaic_0001>
module attributes {stable_mosaic.version = 11 : i64} {
  func.func @_weighting_kernel(%arg0: i32, %arg1: memref<32x1xf32, #tpu.memory_space<vmem>>, %arg2: memref<1x1xf32, #tpu.memory_space<smem>>, %arg3: memref<1x1xi32, #tpu.memory_space<smem>>, %arg4: memref<32x2048xbf16, #tpu.memory_space<vmem>>, %arg5: memref<1x2048xf32, #tpu.memory_space<vmem>>) attributes {dimension_semantics = [#tpu.dimension_semantics<parallel>], iteration_bounds = array<i64: 2>, scalar_prefetch = 0 : i64, scratch_operands = 0 : i64, tpu.core_type = #tpu.core_type<tc>, window_params = [{pipeline_mode = #tpu.pipeline_mode<synchronous>, transform_indices = @transform_0, window_bounds = array<i64: 32, 1>}, {transform_indices = @transform_1, window_bounds = array<i64: 1, 1>}, {transform_indices = @transform_2, window_bounds = array<i64: 1, 1>}, {transform_indices = @transform_3, window_bounds = array<i64: 32, 2048>}, {transform_indices = @transform_4, window_bounds = array<i64: 1, 2048>}]} {
    %0 = tpu.iota {dimensions = array<i32: 1>} : vector<1x2048xi32>
    %c2048_i32 = arith.constant 2048 : i32
    %1 = arith.muli %arg0, %c2048_i32 : i32
    %2 = vector.broadcast %1 : i32 to vector<1x2048xi32>
    %3 = arith.addi %0, %2 : vector<1x2048xi32>
    %c0 = arith.constant 0 : index
    %c0_0 = arith.constant 0 : index
    %4 = memref.load %arg3[%c0, %c0_0] : memref<1x1xi32, #tpu.memory_space<smem>>
    %5 = vector.broadcast %4 : i32 to vector<1x2048xi32>
    %6 = arith.cmpi slt, %3, %5 : vector<1x2048xi32>
    %7 = arith.extui %6 : vector<1x2048xi1> to vector<1x2048xi32>
    %8 = arith.sitofp %7 : vector<1x2048xi32> to vector<1x2048xf32>
    %c0_1 = arith.constant 0 : index
    %c0_2 = arith.constant 0 : index
    %9 = vector.load %arg4[%c0_1, %c0_2] : memref<32x2048xbf16, #tpu.memory_space<vmem>>, vector<32x2048xbf16>
    %10 = arith.extf %9 : vector<32x2048xbf16> to vector<32x2048xf32>
    %c0_3 = arith.constant 0 : index
    %c0_4 = arith.constant 0 : index
    %11 = vector.load %arg1[%c0_3, %c0_4] : memref<32x1xf32, #tpu.memory_space<vmem>>, vector<32x1xf32>
    %12 = vector.broadcast %11 : vector<32x1xf32> to vector<32x2048xf32>
    %13 = arith.mulf %10, %12 : vector<32x2048xf32>
    %14 = vector.extract_strided_slice %13 {offsets = [0, 0], sizes = [8, 2048], strides = [1, 1]} : vector<32x2048xf32> to vector<8x2048xf32>
    %15 = vector.extract_strided_slice %13 {offsets = [8, 0], sizes = [8, 2048], strides = [1, 1]} : vector<32x2048xf32> to vector<8x2048xf32>
    %16 = arith.addf %14, %15 : vector<8x2048xf32>
    %17 = vector.extract_strided_slice %13 {offsets = [16, 0], sizes = [8, 2048], strides = [1, 1]} : vector<32x2048xf32> to vector<8x2048xf32>
    %18 = arith.addf %16, %17 : vector<8x2048xf32>
    %19 = vector.extract_strided_slice %13 {offsets = [24, 0], sizes = [8, 2048], strides = [1, 1]} : vector<32x2048xf32> to vector<8x2048xf32>
    %20 = arith.addf %18, %19 : vector<8x2048xf32>
    %cst = arith.constant dense<0.000000e+00> : vector<2048xf32>
    %21 = vector.multi_reduction <add>, %20, %cst [0] : vector<8x2048xf32> to vector<2048xf32>
    %22 = vector.shape_cast %21 : vector<2048xf32> to vector<1x2048xf32>
    %c0_5 = arith.constant 0 : index
    %c0_6 = arith.constant 0 : index
    %23 = memref.load %arg2[%c0_5, %c0_6] : memref<1x1xf32, #tpu.memory_space<smem>>
    %24 = vector.broadcast %23 : f32 to vector<1x2048xf32>
    %25 = arith.addf %22, %24 : vector<1x2048xf32>
    %26 = math.tanh %25 : vector<1x2048xf32>
    %cst_7 = arith.constant 1.000000e-01 : f32
    %27 = vector.broadcast %cst_7 : f32 to vector<1x2048xf32>
    %28 = arith.mulf %26, %27 : vector<1x2048xf32>
    %cst_8 = arith.constant 1.000000e+00 : f32
    %29 = vector.broadcast %cst_8 : f32 to vector<1x2048xf32>
    %30 = arith.addf %29, %28 : vector<1x2048xf32>
    %31 = arith.mulf %30, %8 : vector<1x2048xf32>
    %c0_9 = arith.constant 0 : index
    %c0_10 = arith.constant 0 : index
    %32 = vector.load %arg5[%c0_9, %c0_10] : memref<1x2048xf32, #tpu.memory_space<vmem>>, vector<1x2048xf32>
    tpu.vector_store %arg5[%c0_9, %c0_10], %31 {strides = array<i32>} : memref<1x2048xf32, #tpu.memory_space<vmem>>, vector<1x2048xf32>,
    return
  }
  func.func @transform_0(%arg0: i32) -> (i32, i32) {
    %c0_i32 = arith.constant 0 : i32
    %c0_i32_0 = arith.constant 0 : i32
    %c0_i32_1 = arith.constant 0 : i32
    return %c0_i32, %c0_i32_0 : i32, i32
  }
  func.func @transform_1(%arg0: i32) -> (i32, i32) {
    %c0_i32 = arith.constant 0 : i32
    %c0_i32_0 = arith.constant 0 : i32
    %c0_i32_1 = arith.constant 0 : i32
    return %c0_i32, %c0_i32_0 : i32, i32
  }
  func.func @transform_2(%arg0: i32) -> (i32, i32) {
    %c0_i32 = arith.constant 0 : i32
    %c0_i32_0 = arith.constant 0 : i32
    %c0_i32_1 = arith.constant 0 : i32
    return %c0_i32, %c0_i32_0 : i32, i32
  }
  func.func @transform_3(%arg0: i32) -> (i32, i32) {
    %c0_i32 = arith.constant 0 : i32
    %c0_i32_0 = arith.constant 0 : i32
    return %c0_i32, %arg0 : i32, i32
  }
  func.func @transform_4(%arg0: i32) -> (i32, i32) {
    %c0_i32 = arith.constant 0 : i32
    %c0_i32_0 = arith.constant 0 : i32
    return %c0_i32, %arg0 : i32, i32
  }
}

</mosaic_0001>

<bundles_post_ra>
// kernel: tpu_custom_call.1
= control target key start
LH: loop header
LB: loop body
LE: loop exit
PB: predicated region body
PF: predicated region fallthrough
CT: control target
= control target key end

     0   :  { %s1748_s0 = inlined_call_operand.vmem [shape: f32[32,1], index: 0, kind: input, shape index: {}]   ;;  %s1749_s1 = inlined_call_operand.<no memory space> [shape: f32[1,1], index: 1, kind: input, shape index: {}]   ;;  %s1750_s2 = inlined_call_operand.<no memory space> [shape: s32[1,1], index: 2, kind: input, shape index: {}]   ;;  %s1751_s3 = inlined_call_operand.hbm [shape: bf16[32,4096], index: 3, kind: input, shape index: {}]   ;;  %s1752_s4 = inlined_call_operand.hbm [shape: f32[1,4096], index: 4, kind: output, shape index: {}]  }
   0x1   :  { %9 = sst [smem:[#allocation2]] %s1749_s1 }
   0x2   :  { %10 = sst [smem:[#allocation3]] %s1750_s2 }
   0x3   :  { %11 = vsyncpa [#allocation5], 0 }
   0x4   :  { %13 = vsyncpa [#allocation5 + $0x1], 0 }
   0x5   :  { %14 = vsyncpa [#allocation6], 0 }
   0x6   :  { %16 = vsyncpa [#allocation6 + $0x1], 0  ;;  %s1108_s19 = smov 0   ;;  %s1110_s20 = smov 0  }
   0x7   :  { %s1112_s21 = smov 0   ;;  %s1114_s22 = smov 0  }
   0x8 LB: > { %s1129_s1 = sadd.s32 4294967295, %s1070_s22   ;;  %s858_s2 = sadd.s32 4294967294, %s1070_s22   ;;  %s1070_s22 = sphi %s1114_s22, %s1880_s22   ;;  %s1066_s21 = sphi %s1112_s21, %s1879_s21   ;;  %s1062_s20 = sphi %s1110_s20, %s1878_s20   ;;  %s1058_s19 = sphi %s1108_s19, %s1877_s19  }
   0x9   : > { %s1133_s23 = sadd.s32 1, %s1070_s22   ;;  %s92_s24 = sadd.s32 1, %s1066_s21 }
   0xa   : > { %s89_s25 = ssub.s32 %s1070_s22, %s1133_s23  ;;  %p99_p0 = scmp.ne.s32.totalorder %s1066_s21, %s1062_s20 }
   0xb   : > { %p90_p1 = scmp.eq.s32.totalorder %s89_s25, 0  ;;  %p100_p2 = scmp.eq.s32.totalorder %s1070_s22, 0 }
   0xc   : > { %p105_p3 = scmp.ne.s32.totalorder %s1062_s20, %s1058_s19  ;;  %p106_p4 = scmp.eq.s32.totalorder %s1129_s1, 0 }
   0xd   : > { %s1145_s26 = scalar_select %p90_p1, %s1066_s21, %s92_s24  }
   0xe   : > { %p1147_p5 = por %p100_p2, %p99_p0  ;;  %p1151_p6 = por %p106_p4, %p105_p3 }
   0xf   : > { %p129_p7 = scmp.eq.s32.totalorder %s1129_s1, 1  ;;  %p135_p8 = scmp.eq.s32.totalorder %s858_s2, 1 }
  0x10   : > { %p860_p9 = scmp.ge.s32.totalorder %s1070_s22, 2  ;;  %p901_p10 = scmp.lt.s32.totalorder %s1070_s22, 2 }
  0x11   : > { %p1158_p11 = por %p129_p7, %p99_p0  ;;  %p1162_p12 = por %p135_p8, %p105_p3 }
  0x12   : > { %s164_s5 = sand.u32 1, %s1066_s21   ;;  %s888_s6 = sshll.u32 %s1070_s22, 6 }
  0x13   : > { %s861_s7 = sshll.u32 %s164_s5, 8  ;;  %s173_s10 = scalar_lea.hbm %s1751_s3, %s888_s6 }
  0x14   : > { %s174_s11 = sshll.u32 %s173_s10, 4  ;;  %s168_s12 = scalar_lea.vmem [#allocation4], %s861_s7  ;;  %s175_s11 = int_to_ptr.hbm [resolvable:$true] %s174_s11 }
  0x15   : > { %s176_s13 = sshll.u32 %s168_s12, 4  ;;  %p1173_p13 = pnand %p901_p10, %p1147_p5  ;;  %s177_s13 = int_to_ptr.vmem [resolvable:$true] %s176_s13 }
  0x16   : > { %p864_p0 = scmp.ge.s32.totalorder %s1070_s22, 1  ;;  %s165_s15 = scalar_lea.sflag [#allocation5], %s164_s5 }
  0x17   : > { %s974_s16 = sshra.s32 %s175_s11, 4  ;;  %p978_p2 = pneg %p1173_p13  ;;  %s975_s16 = int_to_ptr.hbm [resolvable:$true] %s974_s16 }
  0x18   : > { %s976_s17 = scalar_lea.hbm %s975_s16, 256  ;;  %s981_s24 = scalar_lea.hbm %s1751_s3, 512 }
  0x19   : > { %p977_p1 = scmp.ne.s32.totalorder %s975_s16, %s976_s17  ;;  %p982_p5 = scmp.lt.s32.totalorder %s975_s16, %s1751_s3 }
  0x1a   : > { %p983_p7 = scmp.lt.s32.totalorder %s981_s24, %s976_s17 }
  0x1b   : > { %p979_p3 = pnand %p978_p2, %p977_p1 }
  0x1c   : > { %p984_p8 = por %p983_p7, %p982_p5 }
  0x1d   : > { %p980_p4 = pneg %p979_p3 }
  0x1f   : > { %p985_p10 = pnand %p984_p8, %p980_p4 }
  0x21   : > { %988 = shalt.err (!%p985_p10)
}
  0x22   : > { %s1072_s5 = smov 2048   ;;  %s1073_s6 = smov 1024  }
  0x23   : > { %s1074_s7 = smov 64   ;;  %p184_p1 = scmp.lt.s32.totalorder %s1070_s22, 3 }
  0x24   : > { %896 = dma.hbm_to_vmem [thread:$0]  (!%p1173_p13), %s175_s11, 4096, %s177_s13, %s165_s15, %s1072_s5, %s1073_s6, %s1074_s7  }
  0x25   : > { %p185_p2 = pnand %p864_p0, %p184_p1 }
  0x27   : > { %188 = sbr.rel (%p185_p2) target bundleno = 265 (0x109), region = 36 }
  0x2c   : > { %s1192_s8 = sand.u32 1, %s1062_s20  }
  0x2d   : > { %s865_s9 = sshll.u32 %s1192_s8, 8  ;;  %s191_s10 = scalar_lea.sflag [#allocation5], %s1192_s8 }
  0x2e   : > { %s1196_s12 = scalar_lea.vmem [#allocation4], %s865_s9 }
  0x2f   : > { %1049 = dma.done.wait (%p1151_p6), %s191_s10, 4096  }
  0x30   : > { %1051 = vsyncadd (%p1151_p6), %s191_s10, 4294963200  ;;  %v1075_v0 = vmov 0   ;;  %v405_v1 = vld [vmem:[%s1748_s0 + $0x10] sm:$0xff]  ;;  %v403_v2 = vld [vmem:[%s1748_s0] sm:$0xff]  ;;  %s1247_s2 = sld [smem:[#allocation3]]  ;;  %v222_v38 = vlaneseq  ;;  %s867_s24 = sshll.u32 %s1129_s1, 11 }
  0x31   : > { %941 = vset.pattern.permute.xlu1 %v1075_v0  ;;  %940 = vset.pattern.permute.xlu0 %v1075_v0  ;;  %v406_v3 = vld [vmem:[%s1748_s0 + $0x18] sm:$0xff]  ;;  %v404_v4 = vld [vmem:[%s1748_s0 + $0x8] sm:$0xff]  ;;  %v1215_v5 = vld [vmem:[%s1196_s12] sm:$0xff]  ;;  %s1622_s25 = sld [smem:[#allocation2]]  ;;  %s866_s27 = sshll.u32 %s1192_s8, 4 }
  0x32   : > { %419 = vperm.xlu1 %941, %v405_v1   ;;  %409 = vperm.xlu0 %940, %v403_v2   ;;  %v1218_v6 = vld [vmem:[%s1196_s12 + $0x8] sm:$0xff]  ;;  %v1221_v7 = vld [vmem:[%s1196_s12 + $0x10] sm:$0xff]  ;;  %v1224_v8 = vld [vmem:[%s1196_s12 + $0x18] sm:$0xff]  ;;  %v339_v12 = vunpack.c.l.bf16 %v1215_v5  ;;  %v340_v13 = vunpack.c.h.bf16 %v1215_v5  ;;  %v223_v60 = vand.u32 127, %v222_v38  ;;  %v240_v2 = vstv %s867_s24  ;;  %s885_s5 = sshll.u32 %s1129_s1, 4  ;;  %s219_s9 = scalar_lea.vmem [#allocation7], %s866_s27 }
  0x33   : > { %v1227_v9 = vld [vmem:[%s1196_s12 + $0x20] sm:$0xff]  ;;  %v1230_v10 = vld [vmem:[%s1196_s12 + $0x28] sm:$0xff]  ;;  %v1233_v11 = vld [vmem:[%s1196_s12 + $0x30] sm:$0xff]  ;;  %v341_v16 = vunpack.c.l.bf16 %v1218_v6  ;;  %v342_v17 = vunpack.c.h.bf16 %v1218_v6  ;;  %s783_s7 = scalar_lea.hbm %s1752_s4, %s885_s5  ;;  %s785_s10 = sshll.u32 %s219_s9, 4  ;;  %s786_s10 = int_to_ptr.vmem [resolvable:$true] %s785_s10 }
  0x34   : > { %v1238_v14 = vld [vmem:[%s1196_s12 + $0x38] sm:$0xff]  ;;  %v1241_v15 = vld [vmem:[%s1196_s12 + $0x80] sm:$0xff]  ;;  %v1250_v20 = vld [vmem:[%s1196_s12 + $0x88] sm:$0xff]  ;;  %v224_v51 = vadd.s32 128, %v223_v60  ;;  %v225_v56 = vadd.s32 256, %v223_v60  ;;  %v226_v50 = vadd.s32 384, %v223_v60  ;;  %v241_v52 = vadd.s32 %v240_v2, %v223_v60 }
  0x35   : > { %v1253_v21 = vld [vmem:[%s1196_s12 + $0x90] sm:$0xff]  ;;  %v1260_v26 = vld [vmem:[%s1196_s12 + $0x98] sm:$0xff]  ;;  %v1263_v27 = vld [vmem:[%s1196_s12 + $0xa0] sm:$0xff]  ;;  %v227_v38 = vadd.s32 512, %v223_v60  ;;  %v228_v48 = vadd.s32 640, %v223_v60  ;;  %v229_v57 = vadd.s32 768, %v223_v60 }
  0x36   : > { %v1270_v32 = vld [vmem:[%s1196_s12 + $0xa8] sm:$0xff]  ;;  %v1273_v33 = vld [vmem:[%s1196_s12 + $0xb0] sm:$0xff]  ;;  %v1280_v39 = vld [vmem:[%s1196_s12 + $0x40] sm:$0xff]  ;;  %v230_v47 = vadd.s32 896, %v223_v60  ;;  %v231_v53 = vadd.s32 1024, %v223_v60  ;;  %v232_v46 = vadd.s32 1152, %v223_v60  ;;  %v242_v41 = vadd.s32 %v240_v2, %v224_v51 }
  0x37   : > { %v1283_v40 = vld [vmem:[%s1196_s12 + $0xb8] sm:$0xff]  ;;  %v1289_v44 = vld [vmem:[%s1196_s12 + $0x48] sm:$0xff]  ;;  %v1297_v49 = vld [vmem:[%s1196_s12 + $0x50] sm:$0xff]  ;;  %v233_v63 = vadd.s32 1280, %v223_v60  ;;  %v234_v45 = vadd.s32 1408, %v223_v60  ;;  %v235_v0 = vadd.s32 1536, %v223_v60  ;;  %v243_v37 = vadd.s32 %v240_v2, %v225_v56 }
  0x38   : > { %v1304_v54 = vld [vmem:[%s1196_s12 + $0x58] sm:$0xff]  ;;  %v1307_v55 = vld [vmem:[%s1196_s12 + $0x60] sm:$0xff]  ;;  %v1314_v61 = vld [vmem:[%s1196_s12 + $0x68] sm:$0xff]  ;;  %v236_v43 = vadd.s32 1664, %v223_v60  ;;  %v237_v1 = vadd.s32 1792, %v223_v60  ;;  %v238_v42 = vadd.s32 1920, %v223_v60  ;;  %v244_v36 = vadd.s32 %v240_v2, %v226_v50 }
  0x39   : > { %v1317_v62 = vld [vmem:[%s1196_s12 + $0x70] sm:$0xff]  ;;  %v245_v58 = vadd.s32 %v240_v2, %v227_v38  ;;  %v246_v35 = vadd.s32 %v240_v2, %v228_v48  ;;  %v247_v59 = vadd.s32 %v240_v2, %v229_v57  ;;  %v248_v34 = vadd.s32 %v240_v2, %v230_v47  ;;  %v1384_v50 = vld [vmem:[%s1196_s12 + $0xc8] sm:$0xff]  ;;  %s773_s11 = scalar_lea.sflag [#allocation6], %s1192_s8  ;;  %s1024_s16 = scalar_lea.hbm %s1752_s4, 32 }
  0x3a   : > { %424 = vperm.xlu1 %941, %v406_v3   ;;  %414 = vperm.xlu0 %940, %v404_v4   ;;  %v1323_v3 = vstv %s1247_s2  ;;  %v1326_v4 = vld [vmem:[%s1196_s12 + $0x78] sm:$0xff]  ;;  %v249_v31 = vadd.s32 %v240_v2, %v231_v53  ;;  %v250_v30 = vadd.s32 %v240_v2, %v232_v46  ;;  %v251_v29 = vadd.s32 %v240_v2, %v233_v63  ;;  %v1387_v51 = vld [vmem:[%s1196_s12 + $0xd0] sm:$0xff] }
  0x3b   : > { %1766 = vst [vmem:[#allocation10_spill] sm:$0xff] %v1323_v3  ;;  %v252_v28 = vadd.s32 %v240_v2, %v234_v45  ;;  %v1339_v25 = vadd.s32 %v240_v2, %v235_v0  ;;  %v1341_v24 = vadd.s32 %v240_v2, %v236_v43  ;;  %v1343_v23 = vadd.s32 %v240_v2, %v237_v1  ;;  %v1424_v60 = vld [vmem:[%s1196_s12 + $0xf0] sm:$0xff]  ;;  %v1430_v0 = vld [vmem:[%s1196_s12 + $0xf8] sm:$0xff] }
  0x3c   : > { %v1345_v22 = vadd.s32 %v240_v2, %v238_v42  ;;  %vm259_vm0 = vcmp.lt.s32.totalorder %v241_v52, %v1323_v3  ;;  %vm260_vm1 = vcmp.lt.s32.totalorder %v242_v41, %v1323_v3  ;;  %vm261_vm2 = vcmp.lt.s32.totalorder %v243_v37, %v1323_v3  ;;  %v1369_v42 = vld [vmem:[%s1196_s12 + $0xc0] sm:$0xff] }
  0x3d   : > { %1767 = vst [vmem:[#allocation11_spill] sm:$0xff] %v1339_v25  ;;  %vm262_vm3 = vcmp.lt.s32.totalorder %v244_v36, %v1323_v3  ;;  %vm263_vm4 = vcmp.lt.s32.totalorder %v245_v58, %v1323_v3  ;;  %vm264_vm5 = vcmp.lt.s32.totalorder %v246_v35, %v1323_v3  ;;  %vm265_vm6 = vcmp.lt.s32.totalorder %v247_v59, %v1323_v3  ;;  %v1410_v58 = vld [vmem:[%s1196_s12 + $0xd8] sm:$0xff]  ;;  %v1421_v59 = vld [vmem:[%s1196_s12 + $0xe8] sm:$0xff] }
  0x3e   : > { %1768 = vst [vmem:[#allocation12_spill] sm:$0xff] %v1341_v24  ;;  %vm266_vm7 = vcmp.lt.s32.totalorder %v248_v34, %v1323_v3  ;;  %vm267_vm8 = vcmp.lt.s32.totalorder %v249_v31, %v1323_v3  ;;  %vm268_vm9 = vcmp.lt.s32.totalorder %v250_v30, %v1323_v3  ;;  %vm269_vm10 = vcmp.lt.s32.totalorder %v251_v29, %v1323_v3  ;;  %v1413_v34 = vld [vmem:[%s1196_s12 + $0xe0] sm:$0xff]  ;;  %s787_s12 = sshll.u32 %s783_s7, 4  ;;  %s788_s12 = int_to_ptr.hbm [resolvable:$true] %s787_s12 }
  0x3f   : > { %1769 = vst [vmem:[#allocation13_spill] sm:$0xff] %v1343_v23  ;;  %vm270_vm11 = vcmp.lt.s32.totalorder %v252_v28, %v1323_v3  ;;  %v1753_v37 = vmov 0.0   ;;  %v1783_v1 = vunpack.c.l.bf16 %v1221_v7  ;;  %v1784_v28 = vunpack.c.h.bf16 %v1221_v7  ;;  %s1018_s13 = sshra.s32 %s788_s12, 4  ;;  %s1019_s13 = int_to_ptr.hbm [resolvable:$true] %s1018_s13 }
  0x40   : > { %1770 = vst [vmem:[#allocation14_spill] sm:$0xff] %v1345_v22  ;;  %v1360_v36 = vsel %vm259_vm0, 1.0, %v1753_v37  ;;  %v1363_v35 = vsel %vm260_vm1, 1.0, %v1753_v37  ;;  %v1366_v41 = vsel %vm261_vm2, 1.0, %v1753_v37  ;;  %v1372_v45 = vsel %vm262_vm3, 1.0, %v1753_v37  ;;  %s1020_s14 = scalar_lea.hbm %s1019_s13, 16  ;;  %p1025_p3 = scmp.lt.s32.totalorder %s1019_s13, %s1752_s4 }
  0x41   : > { %1771 = vst [vmem:[#allocation15_spill] sm:$0xff] %v1360_v36  ;;  %v1375_v46 = vsel %vm263_vm4, 1.0, %v1753_v37  ;;  %v1378_v47 = vsel %vm264_vm5, 1.0, %v1753_v37  ;;  %v1381_v48 = vsel %vm265_vm6, 1.0, %v1753_v37  ;;  %v1392_v52 = vsel %vm266_vm7, 1.0, %v1753_v37  ;;  %p1021_p6 = scmp.ne.s32.totalorder %s1019_s13, %s1020_s14  ;;  %p1026_p4 = scmp.lt.s32.totalorder %s1024_s16, %s1020_s14 }
  0x42   : > { %1772 = vst [vmem:[#allocation16_spill] sm:$0xff] %v1363_v35  ;;  %v1397_v53 = vsel %vm267_vm8, 1.0, %v1753_v37  ;;  %v1402_v56 = vsel %vm268_vm9, 1.0, %v1753_v37  ;;  %v1407_v57 = vsel %vm269_vm10, 1.0, %v1753_v37  ;;  %v1418_v31 = vsel %vm270_vm11, 1.0, %v1753_v37 }
  0x43   : > { %1773 = vst [vmem:[#allocation17_spill] sm:$0xff] %v1366_v41  ;;  %v1785_v38 = vunpack.c.l.bf16 %v1224_v8  ;;  %v1790_v7 = vunpack.c.h.bf16 %v1230_v10  ;;  %v1825_v25 = vunpack.c.l.bf16 %v1304_v54  ;;  %v1826_v3 = vunpack.c.h.bf16 %v1304_v54  ;;  %p1022_p13 = pnand %p1021_p6, %p1158_p11  ;;  %p1027_p5 = por %p1026_p4, %p1025_p3 }
  0x44   : > { %1774 = vst [vmem:[#allocation18_spill] sm:$0xff] %v1372_v45  ;;  %v1800_v45 = vunpack.c.h.bf16 %v1253_v21  ;;  %v1832_v54 = vunpack.c.h.bf16 %v1317_v62  ;;  %vm747_vm0 = vcmask 1040384   ;;  %vm749_vm1 = vcmask 1042434  }
  0x45   : > { %1775 = vst [vmem:[#allocation19_spill] sm:$0xff] %v1375_v46  ;;  %v1799_v46 = vunpack.c.l.bf16 %v1253_v21  ;;  %v1808_v21 = vunpack.c.l.bf16 %v1270_v32  ;;  %vm753_vm2 = vcmask 1044484   ;;  %vm751_vm3 = vcmask 1041408   ;;  %p1023_p0 = pneg %p1022_p13 }
  0x46   : > { %1776 = vst [vmem:[#allocation20_spill] sm:$0xff] %v1378_v47  ;;  %vm755_vm4 = vcmask 1046534   ;;  %vm757_vm5 = vcmask 1045508   ;;  %vm759_vm6 = vcmask 1043456  }
  0x47   : > { %1777 = vst [vmem:[#allocation21_spill] sm:$0xff] %v1381_v48  ;;  %v1797_v48 = vunpack.c.l.bf16 %v1250_v20  ;;  %p1028_p7 = pnand %p1027_p5, %p1023_p0 }
  0x48   : > { %1778 = vst [vmem:[#allocation22_spill] sm:$0xff] %v1392_v52  ;;  %v1796_v52 = vunpack.c.h.bf16 %v1241_v15 }
  0x49   : > { %1779 = vst [vmem:[#allocation23_spill] sm:$0xff] %v1397_v53 }
  0x4a   : > { %1780 = vst [vmem:[#allocation24_spill] sm:$0xff] %v1402_v56 }
  0x4b   : > { %1781 = vst [vmem:[#allocation25_spill] sm:$0xff] %v1407_v57 }
  0x4c   : > { %1782 = vst [vmem:[#allocation26_spill] sm:$0xff] %v1418_v31 }
  0xa4   : > { %v410_v43 = vpop.permute.xlu0 %409  ;;  %v420_v19 = vpop.permute.xlu1 %419 }
  0xa5   : > { %v427_v37 = vmul.f32 %v410_v43, %v339_v12  ;;  %v428_v30 = vmul.f32 %v410_v43, %v340_v13  ;;  %v429_v29 = vmul.f32 %v410_v43, %v341_v16  ;;  %v430_v18 = vmul.f32 %v410_v43, %v342_v17 }
  0xa6   : > { %v431_v2 = vmul.f32 %v410_v43, %v1783_v1  ;;  %v432_v63 = vmul.f32 %v410_v43, %v1784_v28  ;;  %v433_v31 = vmul.f32 %v410_v43, %v1785_v38  ;;  %v1786_v12 = vunpack.c.h.bf16 %v1224_v8 }
  0xa7   : > { %v1787_v13 = vunpack.c.l.bf16 %v1227_v9  ;;  %v1788_v16 = vunpack.c.h.bf16 %v1227_v9  ;;  %v1789_v17 = vunpack.c.l.bf16 %v1230_v10  ;;  %v1476_v28 = vmul.f32 %v410_v43, %v1790_v7 }
  0xa8   : > { %v434_v5 = vmul.f32 %v410_v43, %v1786_v12  ;;  %v1791_v38 = vunpack.c.l.bf16 %v1233_v11  ;;  %v1792_v12 = vunpack.c.h.bf16 %v1233_v11  ;;  %v1793_v9 = vunpack.c.l.bf16 %v1238_v14 }
  0xa9   : > { %v1464_v57 = vmul.f32 %v410_v43, %v1787_v13  ;;  %v1468_v6 = vmul.f32 %v410_v43, %v1788_v16  ;;  %v1472_v1 = vmul.f32 %v410_v43, %v1789_v17  ;;  %v1794_v17 = vunpack.c.h.bf16 %v1238_v14 }
  0xaa   : > { %v1480_v8 = vmul.f32 %v410_v43, %v1791_v38  ;;  %v1484_v13 = vmul.f32 %v410_v43, %v1792_v12  ;;  %v1488_v16 = vmul.f32 %v410_v43, %v1793_v9  ;;  %v1795_v10 = vunpack.c.l.bf16 %v1241_v15 }
  0xab   : > { %v1492_v53 = vmul.f32 %v410_v43, %v1794_v17  ;;  %v460_v38 = vmul.f32 %v420_v19, %v1796_v52  ;;  %v461_v11 = vmul.f32 %v420_v19, %v1797_v48  ;;  %v1798_v12 = vunpack.c.h.bf16 %v1250_v20 }
  0xac   : > { %v415_v56 = vpop.permute.xlu0 %414  ;;  %v459_v7 = vmul.f32 %v420_v19, %v1795_v10  ;;  %v463_v9 = vmul.f32 %v420_v19, %v1799_v46  ;;  %v464_v14 = vmul.f32 %v420_v19, %v1800_v45  ;;  %v1801_v43 = vunpack.c.l.bf16 %v1260_v26 }
  0xad   : > { %v462_v47 = vmul.f32 %v420_v19, %v1798_v12  ;;  %v1802_v10 = vunpack.c.h.bf16 %v1260_v26  ;;  %v1803_v15 = vunpack.c.l.bf16 %v1263_v27  ;;  %v1805_v48 = vunpack.c.h.bf16 %v1263_v27 }
  0xae   : > { %v465_v17 = vmul.f32 %v420_v19, %v1801_v43  ;;  %v1807_v12 = vunpack.c.l.bf16 %v1280_v39  ;;  %v1522_v45 = vmul.f32 %v420_v19, %v1808_v21  ;;  %v1810_v43 = vunpack.c.h.bf16 %v1270_v32 }
  0xaf   : > { %v466_v41 = vmul.f32 %v420_v19, %v1802_v10  ;;  %v1512_v52 = vmul.f32 %v420_v19, %v1803_v15  ;;  %v1516_v20 = vmul.f32 %v420_v19, %v1805_v48  ;;  %v1812_v26 = vunpack.c.l.bf16 %v1273_v33 }
  0xb0   : > { %v443_v46 = vmul.f32 %v415_v56, %v1807_v12  ;;  %1809 = vst [vmem:[#allocation29_spill] sm:$0xff] %v1522_v45  ;;  %v1526_v35 = vmul.f32 %v420_v19, %v1810_v43  ;;  %v1814_v15 = vunpack.c.h.bf16 %v1280_v39  ;;  %v1815_v48 = vunpack.c.h.bf16 %v1273_v33 }
  0xb1   : > { %1804 = vst [vmem:[#allocation27_spill] sm:$0xff] %v1512_v52  ;;  %v1530_v10 = vmul.f32 %v420_v19, %v1812_v26  ;;  %v1817_v12 = vunpack.c.l.bf16 %v1283_v40  ;;  %v1819_v21 = vunpack.c.h.bf16 %v1283_v40  ;;  %v1821_v43 = vunpack.c.l.bf16 %v1289_v44 }
  0xb2   : > { %1806 = vst [vmem:[#allocation28_spill] sm:$0xff] %v1516_v20  ;;  %v444_v27 = vmul.f32 %v415_v56, %v1814_v15  ;;  %v1536_v36 = vmul.f32 %v420_v19, %v1815_v48  ;;  %v1822_v26 = vunpack.c.h.bf16 %v1289_v44  ;;  %v1823_v39 = vunpack.c.l.bf16 %v1297_v49  ;;  %v425_v44 = vpop.permute.xlu1 %424 }
  0xb3   : > { %1811 = vst [vmem:[#allocation30_spill] sm:$0xff] %v1526_v35  ;;  %v1540_v22 = vmul.f32 %v420_v19, %v1817_v12  ;;  %v1544_v32 = vmul.f32 %v420_v19, %v1819_v21  ;;  %v445_v23 = vmul.f32 %v415_v56, %v1821_v43  ;;  %v1824_v33 = vunpack.c.h.bf16 %v1297_v49 }
  0xb4   : > { %1813 = vst [vmem:[#allocation31_spill] sm:$0xff] %v1530_v10  ;;  %v446_v24 = vmul.f32 %v415_v56, %v1822_v26  ;;  %v447_v15 = vmul.f32 %v415_v56, %v1823_v39  ;;  %v449_v12 = vmul.f32 %v415_v56, %v1825_v25  ;;  %v450_v40 = vmul.f32 %v415_v56, %v1826_v3 }
  0xb5   : > { %1816 = vst [vmem:[#allocation32_spill] sm:$0xff] %v1536_v36  ;;  %v448_v48 = vmul.f32 %v415_v56, %v1824_v33  ;;  %v1827_v19 = vunpack.c.l.bf16 %v1307_v55  ;;  %v1828_v43 = vunpack.c.h.bf16 %v1307_v55  ;;  %v1829_v26 = vunpack.c.l.bf16 %v1314_v61 }
  0xb6   : > { %1818 = vst [vmem:[#allocation33_spill] sm:$0xff] %v1540_v22  ;;  %v1830_v39 = vunpack.c.h.bf16 %v1314_v61  ;;  %v1831_v33 = vunpack.c.l.bf16 %v1317_v62  ;;  %v491_v25 = vadd.f32 %v443_v46, %v427_v37  ;;  %v456_v3 = vmul.f32 %v415_v56, %v1832_v54 }
  0xb7   : > { %1820 = vst [vmem:[#allocation34_spill] sm:$0xff] %v1544_v32  ;;  %v451_v21 = vmul.f32 %v415_v56, %v1827_v19  ;;  %v452_v32 = vmul.f32 %v415_v56, %v1828_v43  ;;  %v453_v22 = vmul.f32 %v415_v56, %v1829_v26  ;;  %v1833_v10 = vunpack.c.l.bf16 %v1326_v4 }
  0xb8   : > { %v454_v49 = vmul.f32 %v415_v56, %v1830_v39  ;;  %v455_v36 = vmul.f32 %v415_v56, %v1831_v33  ;;  %v1834_v55 = vunpack.c.h.bf16 %v1326_v4  ;;  %v492_v35 = vadd.f32 %v444_v27, %v428_v30 }
  0xb9   : > { %v457_v19 = vmul.f32 %v415_v56, %v1833_v10  ;;  %v493_v45 = vadd.f32 %v445_v23, %v429_v29  ;;  %v494_v20 = vadd.f32 %v446_v24, %v430_v18  ;;  %v495_v26 = vadd.f32 %v447_v15, %v431_v2 }
  0xba   : > { %v458_v43 = vmul.f32 %v415_v56, %v1834_v55  ;;  %v496_v52 = vadd.f32 %v448_v48, %v432_v63  ;;  %v1835_v61 = vunpack.c.l.bf16 %v1369_v42  ;;  %v1836_v33 = vunpack.c.h.bf16 %v1369_v42 }
  0xbb   : > { %v1837_v62 = vunpack.c.l.bf16 %v1384_v50  ;;  %v1838_v54 = vunpack.c.h.bf16 %v1384_v50  ;;  %v1839_v4 = vunpack.c.l.bf16 %v1387_v51  ;;  %v1840_v23 = vunpack.c.h.bf16 %v1387_v51 }
  0xbc   : > { %v475_v39 = vmul.f32 %v425_v44, %v1835_v61  ;;  %v476_v37 = vmul.f32 %v425_v44, %v1836_v33  ;;  %v497_v24 = vadd.f32 %v449_v12, %v433_v31  ;;  %v507_v30 = vadd.f32 %v491_v25, %v459_v7 }
  0xbd   : > { %v477_v46 = vmul.f32 %v425_v44, %v1837_v62  ;;  %v478_v10 = vmul.f32 %v425_v44, %v1838_v54  ;;  %v479_v56 = vmul.f32 %v425_v44, %v1839_v4  ;;  %v480_v18 = vmul.f32 %v425_v44, %v1840_v23 }
  0xbe   : > { %v1841_v63 = vunpack.c.l.bf16 %v1410_v58  ;;  %v1842_v42 = vunpack.c.h.bf16 %v1410_v58  ;;  %v498_v27 = vadd.f32 %v450_v40, %v434_v5  ;;  %v508_v15 = vadd.f32 %v492_v35, %v460_v38 }
  0xbf   : > { %v509_v48 = vadd.f32 %v493_v45, %v461_v11  ;;  %v510_v55 = vadd.f32 %v494_v20, %v462_v47  ;;  %v511_v50 = vadd.f32 %v495_v26, %v463_v9  ;;  %v512_v61 = vadd.f32 %v496_v52, %v464_v14 }
  0xc0   : > { %v481_v29 = vmul.f32 %v425_v44, %v1841_v63  ;;  %v482_v2 = vmul.f32 %v425_v44, %v1842_v42  ;;  %v1843_v33 = vunpack.c.l.bf16 %v1413_v34  ;;  %v1844_v51 = vunpack.c.h.bf16 %v1413_v34  ;;  %v1858_v42 = vld [vmem:[#allocation34_spill] sm:$0xff] }
  0xc1   : > { %v1845_v31 = vunpack.c.l.bf16 %v1421_v59  ;;  %v1846_v12 = vunpack.c.h.bf16 %v1421_v59  ;;  %v1847_v58 = vunpack.c.l.bf16 %v1424_v60  ;;  %v1848_v35 = vunpack.c.h.bf16 %v1424_v60 }
  0xc2   : > { %v483_v62 = vmul.f32 %v425_v44, %v1843_v33  ;;  %v484_v54 = vmul.f32 %v425_v44, %v1844_v51  ;;  %v513_v38 = vadd.f32 %v497_v24, %v465_v17  ;;  %v523_v11 = vadd.f32 %v507_v30, %v475_v39  ;;  %v1856_v30 = vld [vmem:[#allocation32_spill] sm:$0xff] }
  0xc3   : > { %v485_v7 = vmul.f32 %v425_v44, %v1845_v31  ;;  %v486_v25 = vmul.f32 %v425_v44, %v1846_v12  ;;  %v487_v5 = vmul.f32 %v425_v44, %v1847_v58  ;;  %v488_v47 = vmul.f32 %v425_v44, %v1848_v35 }
  0xc4   : > { %v1849_v9 = vunpack.c.l.bf16 %v1430_v0  ;;  %v1850_v34 = vunpack.c.h.bf16 %v1430_v0  ;;  %v514_v20 = vadd.f32 %v498_v27, %v466_v41  ;;  %v524_v45 = vadd.f32 %v508_v15, %v476_v37 }
  0xc5   : > { %v525_v40 = vadd.f32 %v509_v48, %v477_v46  ;;  %v526_v26 = vadd.f32 %v510_v55, %v478_v10  ;;  %v527_v59 = vadd.f32 %v511_v50, %v479_v56  ;;  %v528_v4 = vadd.f32 %v512_v61, %v480_v18 }
  0xc6   : > { %v489_v14 = vmul.f32 %v425_v44, %v1849_v9  ;;  %v490_v52 = vmul.f32 %v425_v44, %v1850_v34  ;;  %v499_v23 = vadd.f32 %v451_v21, %v1464_v57  ;;  %v500_v63 = vadd.f32 %v452_v32, %v1468_v6  ;;  %v1851_v32 = vld [vmem:[#allocation27_spill] sm:$0xff] }
  0xc7   : > { %v501_v60 = vadd.f32 %v453_v22, %v1472_v1  ;;  %v502_v17 = vadd.f32 %v454_v49, %v1476_v28  ;;  %v503_v39 = vadd.f32 %v455_v36, %v1480_v8  ;;  %v504_v24 = vadd.f32 %v456_v3, %v1484_v13  ;;  %v1852_v1 = vld [vmem:[#allocation28_spill] sm:$0xff]  ;;  %v1853_v49 = vld [vmem:[#allocation29_spill] sm:$0xff]  ;;  %v1854_v8 = vld [vmem:[#allocation30_spill] sm:$0xff] }
  0xc8   : > { %v529_v0 = vadd.f32 %v513_v38, %v481_v29  ;;  %v539_v44 = vrot.slane %v523_v11, 4  ;;  %v505_v41 = vadd.f32 %v457_v19, %v1488_v16  ;;  %v506_v37 = vadd.f32 %v458_v43, %v1492_v53  ;;  %v1855_v3 = vld [vmem:[#allocation31_spill] sm:$0xff]  ;;  %v1857_v43 = vld [vmem:[#allocation33_spill] sm:$0xff] }
  0xc9   : > { %v530_v46 = vadd.f32 %v514_v20, %v482_v2  ;;  %v545_v10 = vrot.slane %v524_v45, 4  ;;  %v551_v56 = vrot.slane %v525_v40, 4  ;;  %v557_v57 = vrot.slane %v526_v26, 4 }
  0xca   : > { %v563_v21 = vrot.slane %v527_v59, 4  ;;  %v569_v6 = vrot.slane %v528_v4, 4  ;;  %v515_v22 = vadd.f32 %v499_v23, %v1851_v32  ;;  %v516_v28 = vadd.f32 %v500_v63, %v1852_v1 }
  0xcb   : > { %v517_v36 = vadd.f32 %v501_v60, %v1853_v49  ;;  %v518_v13 = vadd.f32 %v502_v17, %v1854_v8  ;;  %v519_v18 = vadd.f32 %v503_v39, %v1855_v3  ;;  %v520_v16 = vadd.f32 %v504_v24, %v1856_v30 }
  0xcc   : > { %v540_v19 = vadd.f32 %v539_v44, %v523_v11  ;;  %v575_v53 = vrot.slane %v529_v0, 4  ;;  %v521_v29 = vadd.f32 %v505_v41, %v1857_v43  ;;  %v522_v2 = vadd.f32 %v506_v37, %v1858_v42 }
  0xcd   : > { %v546_v27 = vadd.f32 %v545_v10, %v524_v45  ;;  %v581_v15 = vrot.slane %v530_v46, 4  ;;  %v552_v48 = vadd.f32 %v551_v56, %v525_v40  ;;  %v558_v55 = vadd.f32 %v557_v57, %v526_v26 }
  0xce   : > { %v564_v50 = vadd.f32 %v563_v21, %v527_v59  ;;  %v570_v61 = vadd.f32 %v569_v6, %v528_v4  ;;  %v531_v33 = vadd.f32 %v515_v22, %v483_v62  ;;  %v532_v51 = vadd.f32 %v516_v28, %v484_v54 }
  0xcf   : > { %v533_v31 = vadd.f32 %v517_v36, %v485_v7  ;;  %v534_v12 = vadd.f32 %v518_v13, %v486_v25  ;;  %v535_v58 = vadd.f32 %v519_v18, %v487_v5  ;;  %v536_v35 = vadd.f32 %v520_v16, %v488_v47 }
  0xd0   : > { %v541_v38 = vrot.slane %v540_v19, 2  ;;  %v576_v9 = vadd.f32 %v575_v53, %v529_v0  ;;  %v537_v11 = vadd.f32 %v521_v29, %v489_v14  ;;  %v538_v34 = vadd.f32 %v522_v2, %v490_v52  ;;  %v1860_v53 = vld [vmem:[#allocation11_spill] sm:$0xff] }
  0xd1   : > { %v547_v20 = vrot.slane %v546_v27, 2  ;;  %v582_v23 = vadd.f32 %v581_v15, %v530_v46  ;;  %v553_v63 = vrot.slane %v552_v48, 2  ;;  %v559_v60 = vrot.slane %v558_v55, 2 }
  0xd2   : > { %v565_v45 = vrot.slane %v564_v50, 2  ;;  %v571_v17 = vrot.slane %v570_v61, 2  ;;  %v587_v40 = vrot.slane %v531_v33, 4  ;;  %v593_v26 = vrot.slane %v532_v51, 4 }
  0xd3   : > { %v599_v59 = vrot.slane %v533_v31, 4  ;;  %v605_v4 = vrot.slane %v534_v12, 4  ;;  %v542_v62 = vadd.f32 %v541_v38, %v540_v19  ;;  %v577_v54 = vrot.slane %v576_v9, 2  ;;  %v1859_v19 = vld [vmem:[#allocation10_spill] sm:$0xff] }
  0xd4   : > { %v611_v7 = vrot.slane %v535_v58, 4  ;;  %v617_v25 = vrot.slane %v536_v35, 4  ;;  %v548_v5 = vadd.f32 %v547_v20, %v546_v27  ;;  %v588_v47 = vadd.f32 %v587_v40, %v531_v33 }
  0xd5   : > { %v594_v39 = vadd.f32 %v593_v26, %v532_v51  ;;  %v623_v24 = vrot.slane %v537_v11, 4  ;;  %v554_v14 = vadd.f32 %v553_v63, %v552_v48  ;;  %v583_v52 = vrot.slane %v582_v23, 2 }
  0xd6   : > { %v600_v0 = vadd.f32 %v599_v59, %v533_v31  ;;  %v629_v44 = vrot.slane %v538_v34, 4  ;;  %v560_v41 = vadd.f32 %v559_v60, %v558_v55  ;;  %v566_v37 = vadd.f32 %v565_v45, %v564_v50  ;;  %v1861_v50 = vld [vmem:[#allocation12_spill] sm:$0xff] }
  0xd7   : > { %v606_v46 = vadd.f32 %v605_v4, %v534_v12  ;;  %v612_v10 = vadd.f32 %v611_v7, %v535_v58  ;;  %v543_v56 = vrot.slane %v542_v62, 1  ;;  %v572_v57 = vadd.f32 %v571_v17, %v570_v61  ;;  %v1862_v12 = vld [vmem:[#allocation13_spill] sm:$0xff] }
  0xd8   : > { %v589_v21 = vrot.slane %v588_v47, 2  ;;  %v618_v6 = vadd.f32 %v617_v25, %v536_v35  ;;  %v549_v32 = vrot.slane %v548_v5, 1  ;;  %v578_v22 = vadd.f32 %v577_v54, %v576_v9 }
  0xd9   : > { %v595_v1 = vrot.slane %v594_v39, 2  ;;  %v624_v28 = vadd.f32 %v623_v24, %v537_v11  ;;  %v555_v49 = vrot.slane %v554_v14, 1  ;;  %v584_v36 = vadd.f32 %v583_v52, %v582_v23  ;;  %v1863_v11 = vld [vmem:[#allocation14_spill] sm:$0xff] }
  0xda   : > { %v601_v8 = vrot.slane %v600_v0, 2  ;;  %v630_v13 = vadd.f32 %v629_v44, %v538_v34  ;;  %v561_v3 = vrot.slane %v560_v41, 1  ;;  %v567_v18 = vrot.slane %v566_v37, 1 }
  0xdb   : > { %v607_v30 = vrot.slane %v606_v46, 2  ;;  %v613_v16 = vrot.slane %v612_v10, 2  ;;  %vm271_vm12 = vcmp.lt.s32.totalorder %v1860_v53, %v1859_v19  ;;  %v544_v43 = vadd.f32 %v543_v56, %v542_v62 }
  0xdc   : > { %v573_v29 = vrot.slane %v572_v57, 1  ;;  %v590_v42 = vadd.f32 %v589_v21, %v588_v47  ;;  %v619_v2 = vrot.slane %v618_v6, 2  ;;  %v550_v27 = vadd.f32 %v549_v32, %v548_v5 }
  0xdd   : > { %v579_v15 = vrot.slane %v578_v22, 1  ;;  %v596_v48 = vadd.f32 %v595_v1, %v594_v39  ;;  %v625_v55 = vrot.slane %v624_v28, 2  ;;  %vm272_vm13 = vcmp.lt.s32.totalorder %v1861_v50, %v1859_v19 }
  0xde   : > { %v556_v61 = vadd.f32 %v555_v49, %v554_v14  ;;  %v585_v33 = vrot.slane %v584_v36, 1  ;;  %v602_v51 = vadd.f32 %v601_v8, %v600_v0  ;;  %v631_v31 = vrot.slane %v630_v13, 2 }
  0xdf   : > { %vm273_vm14 = vcmp.lt.s32.totalorder %v1862_v12, %v1859_v19  ;;  %v562_v58 = vadd.f32 %v561_v3, %v560_v41  ;;  %v608_v35 = vadd.f32 %v607_v30, %v606_v46  ;;  %v614_v38 = vadd.f32 %v613_v16, %v612_v10  ;;  %v1865_v12 = vld [vmem:[#allocation15_spill] sm:$0xff] }
  0xe0   : > { %v1631_v9 = vstv %s1622_s25  ;;  %vm274_vm15 = vcmp.lt.s32.totalorder %v1863_v11, %v1859_v19  ;;  %v568_v34 = vadd.f32 %v567_v18, %v566_v37  ;;  %v591_v20 = vrot.slane %v590_v42, 1 }
  0xe1   : > { %v620_v23 = vadd.f32 %v619_v2, %v618_v6  ;;  %v637_v63 = vadd.f32 %v1631_v9, %v544_v43  ;;  %v574_v60 = vadd.f32 %v573_v29, %v572_v57  ;;  %v597_v45 = vrot.slane %v596_v48, 1 }
  0xe2   : > { %v626_v17 = vadd.f32 %v625_v55, %v624_v28  ;;  %v638_v40 = vadd.f32 %v1631_v9, %v550_v27  ;;  %v580_v26 = vadd.f32 %v579_v15, %v578_v22  ;;  %v603_v59 = vrot.slane %v602_v51, 1 }
  0xe3   : > { %v632_v4 = vadd.f32 %v631_v31, %v630_v13  ;;  %v639_v62 = vadd.f32 %v1631_v9, %v556_v61  ;;  %v586_v54 = vadd.f32 %v585_v33, %v584_v36  ;;  %v609_v7 = vrot.slane %v608_v35, 1 }
  0xe4   : > { %v615_v25 = vrot.slane %v614_v38, 1  ;;  %v640_v5 = vadd.f32 %v1631_v9, %v562_v58  ;;  %v592_v47 = vadd.f32 %v591_v20, %v590_v42  ;;  %v621_v39 = vrot.slane %v620_v23, 1 }
  0xe5   : > { %v641_v24 = vadd.f32 %v1631_v9, %v568_v34  ;;  %942 = vtanh.f32 %v637_v63  ;;  %v598_v14 = vadd.f32 %v597_v45, %v596_v48  ;;  %v627_v52 = vrot.slane %v626_v17, 1  ;;  %v1866_v34 = vld [vmem:[#allocation16_spill] sm:$0xff] }
  0xe6   : > { %v642_v0 = vadd.f32 %v1631_v9, %v574_v60  ;;  %944 = vtanh.f32 %v638_v40  ;;  %v604_v44 = vadd.f32 %v603_v59, %v602_v51  ;;  %v633_v41 = vrot.slane %v632_v4, 1  ;;  %v1867_v60 = vld [vmem:[#allocation17_spill] sm:$0xff]  ;;  %v1868_v59 = vld [vmem:[#allocation18_spill] sm:$0xff] }
  0xe7   : > { %v643_v37 = vadd.f32 %v1631_v9, %v580_v26  ;;  %946 = vtanh.f32 %v639_v62  ;;  %v1864_v46 = vmov 0.0   ;;  %v610_v56 = vadd.f32 %v609_v7, %v608_v35 }
  0xe8   : > { %v1646_v10 = vsel %vm271_vm12, 1.0, %v1864_v46  ;;  %v644_v57 = vadd.f32 %v1631_v9, %v586_v54  ;;  %948 = vtanh.f32 %v640_v5  ;;  %v616_v21 = vadd.f32 %v615_v25, %v614_v38  ;;  %v1869_v25 = vld [vmem:[#allocation19_spill] sm:$0xff] }
  0xe9   : > { %v622_v6 = vadd.f32 %v621_v39, %v620_v23  ;;  %v645_v32 = vadd.f32 %v1631_v9, %v592_v47  ;;  %950 = vtanh.f32 %v641_v24  ;;  %v1654_v22 = vsel %vm272_vm13, 1.0, %v1864_v46 }
  0xea   : > { %v628_v1 = vadd.f32 %v627_v52, %v626_v17  ;;  %v646_v28 = vadd.f32 %v1631_v9, %v598_v14  ;;  %952 = vtanh.f32 %v642_v0  ;;  %v1661_v36 = vsel %vm273_vm14, 1.0, %v1864_v46  ;;  %v1870_v14 = vld [vmem:[#allocation20_spill] sm:$0xff] }
  0xeb   : > { %v943_v49 = vpop.eup %942  ;;  %v634_v8 = vadd.f32 %v633_v41, %v632_v4  ;;  %v647_v13 = vadd.f32 %v1631_v9, %v604_v44  ;;  %954 = vtanh.f32 %v643_v37  ;;  %v1668_v18 = vsel %vm274_vm15, 1.0, %v1864_v46  ;;  %v1871_v46 = vld [vmem:[#allocation21_spill] sm:$0xff] }
  0xec   : > { %v945_v3 = vpop.eup %944  ;;  %v648_v30 = vadd.f32 %v1631_v9, %v610_v56  ;;  %956 = vtanh.f32 %v644_v57  ;;  %v669_v16 = vmul.f32 0.1, %v943_v49  ;;  %v649_v43 = vadd.f32 %v1631_v9, %v616_v21 }
  0xed   : > { %v947_v53 = vpop.eup %946  ;;  %v650_v29 = vadd.f32 %v1631_v9, %v622_v6  ;;  %958 = vtanh.f32 %v645_v32  ;;  %v670_v42 = vmul.f32 0.1, %v945_v3  ;;  %v651_v27 = vadd.f32 %v1631_v9, %v628_v1  ;;  %v1872_v1 = vld [vmem:[#allocation22_spill] sm:$0xff] }
  0xee   : > { %v949_v2 = vpop.eup %948  ;;  %960 = vtanh.f32 %v646_v28  ;;  %v671_v15 = vmul.f32 0.1, %v947_v53  ;;  %v685_v48 = vadd.f32 1.0, %v669_v16  ;;  %v652_v55 = vadd.f32 %v1631_v9, %v634_v8 }
  0xef   : > { %v951_v19 = vpop.eup %950  ;;  %962 = vtanh.f32 %v647_v13  ;;  %v672_v50 = vmul.f32 0.1, %v949_v2  ;;  %v686_v61 = vadd.f32 1.0, %v670_v42  ;;  %v1874_v2 = vld [vmem:[#allocation24_spill] sm:$0xff] }
  0xf0   : > { %v953_v33 = vpop.eup %952  ;;  %964 = vtanh.f32 %v648_v30  ;;  %v673_v51 = vmul.f32 0.1, %v951_v19  ;;  %v687_v31 = vadd.f32 1.0, %v671_v15  ;;  %v1676_v58 = vmul.f32 %v1865_v12, %v685_v48  ;;  %v1873_v30 = vld [vmem:[#allocation23_spill] sm:$0xff]  ;;  %v1876_v12 = vld [vmem:[#allocation26_spill] sm:$0xff] }
  0xf1   : > { %v955_v35 = vpop.eup %954  ;;  %966 = vtanh.f32 %v649_v43  ;;  %v674_v38 = vmul.f32 0.1, %v953_v33  ;;  %v688_v11 = vadd.f32 1.0, %v672_v50  ;;  %v1679_v20 = vmul.f32 %v1866_v34, %v686_v61  ;;  %v1875_v50 = vld [vmem:[#allocation25_spill] sm:$0xff] }
  0xf2   : > { %v957_v23 = vpop.eup %956  ;;  %968 = vtanh.f32 %v650_v29  ;;  %v675_v9 = vmul.f32 0.1, %v955_v35  ;;  %v689_v63 = vadd.f32 1.0, %v673_v51  ;;  %v1682_v45 = vmul.f32 %v1867_v60, %v687_v31 }
  0xf3   : > { %v959_v17 = vpop.eup %958  ;;  %970 = vtanh.f32 %v651_v27  ;;  %v676_v40 = vmul.f32 0.1, %v957_v23  ;;  %v690_v26 = vadd.f32 1.0, %v674_v38  ;;  %v704_v4 = vmul.f32 %v1868_v59, %v688_v11 }
  0xf4   : > { %v961_v62 = vpop.eup %960  ;;  %972 = vtanh.f32 %v652_v55  ;;  %v677_v54 = vmul.f32 0.1, %v959_v17  ;;  %v691_v7 = vadd.f32 1.0, %v675_v9  ;;  %v705_v5 = vmul.f32 %v1869_v25, %v689_v63 }
  0xf5   : > { %v963_v47 = vpop.eup %962  ;;  %v678_v39 = vmul.f32 0.1, %v961_v62  ;;  %v692_v24 = vadd.f32 1.0, %v676_v40  ;;  %v706_v52 = vmul.f32 %v1870_v14, %v690_v26  ;;  %v733_v0 = vrot.slane %v1679_v20, 7 }
  0xf6   : > { %v965_v44 = vpop.eup %964  ;;  %v679_v41 = vmul.f32 0.1, %v963_v47  ;;  %v693_v37 = vadd.f32 1.0, %v677_v54  ;;  %v707_v56 = vmul.f32 %v1871_v46, %v691_v7  ;;  %v734_v57 = vrot.slane %v1682_v45, 6 }
  0xf7   : > { %v967_v21 = vpop.eup %966  ;;  %v680_v6 = vmul.f32 0.1, %v965_v44  ;;  %v694_v32 = vadd.f32 1.0, %v678_v39  ;;  %v708_v28 = vmul.f32 %v1872_v1, %v692_v24  ;;  %v735_v49 = vrot.slane %v704_v4, 5 }
  0xf8   : > { %v969_v8 = vpop.eup %968  ;;  %v681_v13 = vmul.f32 0.1, %v967_v21  ;;  %v695_v3 = vadd.f32 1.0, %v679_v41  ;;  %v709_v16 = vmul.f32 %v1873_v30, %v693_v37  ;;  %v736_v53 = vrot.slane %v705_v5, 4 }
  0xf9   : > { %v971_v43 = vpop.eup %970  ;;  %v682_v29 = vmul.f32 0.1, %v969_v8  ;;  %v696_v42 = vadd.f32 1.0, %v680_v6  ;;  %v710_v27 = vmul.f32 %v1874_v2, %v694_v32  ;;  %v737_v15 = vrot.slane %v706_v52, 3 }
  0xfa   : > { %v973_v48 = vpop.eup %972  ;;  %v683_v19 = vmul.f32 0.1, %v971_v43  ;;  %v697_v55 = vadd.f32 1.0, %v681_v13  ;;  %v711_v61 = vmul.f32 %v1875_v50, %v695_v3  ;;  %v738_v33 = vrot.slane %v707_v56, 2 }
  0xfb   : > { %v684_v51 = vmul.f32 0.1, %v973_v48  ;;  %v698_v31 = vadd.f32 1.0, %v682_v29  ;;  %v712_v35 = vmul.f32 %v1876_v12, %v696_v42  ;;  %v739_v38 = vrot.slane %v708_v28, 1 }
  0xfc   : > { %v699_v11 = vadd.f32 1.0, %v683_v19  ;;  %v713_v34 = vmul.f32 %v1646_v10, %v697_v55  ;;  %v740_v20 = vrot.slane %v710_v27, 7  ;;  %v741_v23 = vrot.slane %v711_v61, 6 }
  0xfd   : > { %v700_v9 = vadd.f32 1.0, %v684_v51  ;;  %v714_v63 = vmul.f32 %v1654_v22, %v698_v31  ;;  %v742_v60 = vrot.slane %v712_v35, 5  ;;  %v748_v45 = vsel %vm747_vm0, %v1676_v58, %v733_v0 }
  0xfe   : > { %v715_v17 = vmul.f32 %v1661_v36, %v699_v11  ;;  %v743_v40 = vrot.slane %v713_v34, 4  ;;  %v750_v26 = vsel %vm749_vm1, %v734_v57, %v735_v49  ;;  %v754_v59 = vsel %vm753_vm2, %v736_v53, %v737_v15 }
  0xff   : > { %v716_v10 = vmul.f32 %v1668_v18, %v700_v9  ;;  %v744_v4 = vrot.slane %v714_v63, 3  ;;  %v752_v22 = vsel %vm751_vm3, %v748_v45, %v750_v26  ;;  %v756_v62 = vsel %vm755_vm4, %v738_v33, %v739_v38 }
 0x100   : > { %v745_v54 = vrot.slane %v715_v17, 2  ;;  %v758_v58 = vsel %vm757_vm5, %v754_v59, %v756_v62  ;;  %v761_v36 = vsel %vm747_vm0, %v709_v16, %v740_v20  ;;  %v762_v7 = vsel %vm749_vm1, %v741_v23, %v742_v60 }
 0x101   : > { %v746_v25 = vrot.slane %v716_v10, 1  ;;  %v760_v5 = vsel %vm759_vm6, %v752_v22, %v758_v58  ;;  %v764_v47 = vsel %vm753_vm2, %v743_v40, %v744_v4  ;;  %v763_v18 = vsel %vm751_vm3, %v761_v36, %v762_v7 }
 0x102   : > { %770 = vst [vmem:[%s219_s9] sm:$0xff] %v760_v5 }
 0x103   : > { %v765_v39 = vsel %vm755_vm4, %v745_v54, %v746_v25 }
 0x104   : > { %v766_v24 = vsel %vm757_vm5, %v764_v47, %v765_v39 }
 0x105   : > { %v767_v14 = vsel %vm759_vm6, %v763_v18, %v766_v24 }
 0x106   : > { %771 = vst [vmem:[%s219_s9 + $0x8] sm:$0xff] %v767_v14 }
 0x107   : > { %1031 = shalt.err (!%p1028_p7)
}
 0x108   : > { %891 = dma.vmem_to_hbm [thread:$0]  (%p1158_p11), %s786_s10, 256, %s788_s12, %s773_s11  }
 0x109 PF: > { %s799_s8 = sand.u32 1, %s1058_s19   ;;  %p898_p8 = pnand %p860_p9, %p1162_p12 }
 0x10a   : > { %s800_s2 = scalar_lea.sflag [#allocation6], %s799_s8 }
 0x10b   : > { %p899_p10 = pneg %p898_p8 }
 0x10d   : > { %1053 = dma.done.wait (%p899_p10), %s800_s2, 256  }
 0x10e   : > { %1055 = vsyncadd (%p899_p10), %s800_s2, 4294967040  ;;  %p19_p1 = scmp.ge.s32.totalorder %s1133_s23, 4   ;;  %s1877_s19 = smov %s1062_s20 }
 0x10f   : > { %s1878_s20 = smov %s1066_s21  ;;  %s1879_s21 = smov %s1145_s26 }
 0x110   : > { %s1880_s22 = smov %s1133_s23  ;;  %21 = sbr.rel (!%p19_p1) target bundleno = 8 (0x8), region = 81 }
 0x115   :  { %806 = vsyncpa [#allocation5], 1 }
 0x116   :  { %808 = vsyncpa [#allocation5 + $0x1], 1 }
 0x117   :  { %809 = vsyncpa [#allocation6], 1 }
 0x118   :  { %811 = vsyncpa [#allocation6 + $0x1], 1 }

</bundles_post_ra>
